<compile_context>
chip_gen: v5e
topology: v5e:2x2
jax: 0.10.0
libtpu: 0.0.40
codegen_flags: <defaults>
</compile_context>

<pallas_src>
import jax
import jax.numpy as jnp
from jax.experimental import pallas as pl
from jax.experimental.pallas import tpu as pltpu

NUM_LAYERS = 3           # LSTM stack depth of the synthesis model
HIDDEN = 32              # hidden size per layer
NUM_ATTN_COMPONENTS = 8  # attention mixture components (kappa width)
ALPHABET_SIZE = 64       # character-window width (w0)

# Lane-dense parameter slab: exactly one (8 sublane x 128 lane) f32 vreg.
PAD_ROWS = 8             # >= 2 * NUM_LAYERS
PAD_LANES = 128          # >= HIDDEN, full lane width (unmasked vst)


def _init_hidden_kernel(hc_ref, out_ref):
    # Single-vreg tanh: one load, one EUP pass, one unmasked full-width store.
    out_ref[...] = jnp.tanh(hc_ref[...])


def pack_initial_state_params(h_param, c_param):
    """One-time (init-time) packing of learned init params into the padded
    lane-dense slab consumed by the kernel."""
    slab = jnp.zeros((PAD_ROWS, PAD_LANES), dtype=jnp.float32)
    hc = jnp.concatenate([h_param, c_param], axis=0)  # [2*L, HIDDEN]
    return slab.at[: 2 * NUM_LAYERS, :HIDDEN].set(hc)


def get_initial_hidden_state(hc_param_slab, batch_size=1):
    assert batch_size == 1, "exported module uses batch_size=1"

    # Gridless single-block pallas_call: whole (8,128) slab resident in VMEM.
    hc = pl.pallas_call(
        _init_hidden_kernel,
        in_specs=[pl.BlockSpec(memory_space=pltpu.MemorySpace.VMEM)],
        out_specs=pl.BlockSpec(memory_space=pltpu.MemorySpace.VMEM),
        out_shape=jax.ShapeDtypeStruct((PAD_ROWS, PAD_LANES), jnp.float32),
    )(hc_param_slab)

    # Glue: slice live region, add the batch dim ([layers, batch, hidden]).
    h = hc[:NUM_LAYERS, :HIDDEN].reshape(NUM_LAYERS, 1, HIDDEN)
    c = hc[NUM_LAYERS : 2 * NUM_LAYERS, :HIDDEN].reshape(NUM_LAYERS, 1, HIDDEN)

    # Constant-zero attention state: produced by XLA, not the kernel.
    kappa = jnp.zeros((1, NUM_ATTN_COMPONENTS), dtype=jnp.float32)
    w0 = jnp.zeros((1, ALPHABET_SIZE), dtype=jnp.float32)

    hidden_core = (h, c)
    return hidden_core, kappa, w0


def exportable_initial_hidden_forward(hc_param_slab):
    """Mirrors ExportableInitialHiddenModel.forward()."""
    hidden_core, kappa, w0 = get_initial_hidden_state(hc_param_slab, 1)
    return (*hidden_core, kappa, w0)


if __name__ == "__main__":
    key = jax.random.PRNGKey(0)
    kh, kc = jax.random.split(key)
    # Deterministic "learned" initial-state parameters.
    h_param = jax.random.normal(kh, (NUM_LAYERS, HIDDEN), dtype=jnp.float32) * 0.5
    c_param = jax.random.normal(kc, (NUM_LAYERS, HIDDEN), dtype=jnp.float32) * 0.5

    # Init-time packing into the lane-dense slab (outside the hot path).
    hc_slab = pack_initial_state_params(h_param, c_param)

    outs = exportable_initial_hidden_forward(hc_slab)
    outs = jax.block_until_ready(outs)
    h0, c0, kappa, w0 = outs

    # Reference check (pure JAX).
    ref_h = jnp.tanh(h_param).reshape(NUM_LAYERS, 1, HIDDEN)
    ref_c = jnp.tanh(c_param).reshape(NUM_LAYERS, 1, HIDDEN)
    assert h0.shape == (NUM_LAYERS, 1, HIDDEN) and c0.shape == (NUM_LAYERS, 1, HIDDEN)
    assert kappa.shape == (1, NUM_ATTN_COMPONENTS) and w0.shape == (1, ALPHABET_SIZE)
    assert jnp.allclose(h0, ref_h, atol=1e-6)
    assert jnp.allclose(c0, ref_c, atol=1e-6)
    assert jnp.all(kappa == 0.0) and jnp.all(w0 == 0.0)

    print("KERNEL_OK")
</pallas_src>

<mosaic_0001>
module attributes {stable_mosaic.version = 11 : i64} {
  func.func @_init_hidden_kernel(%arg0: memref<8x128xf32, #tpu.memory_space<vmem>>, %arg1: memref<8x128xf32, #tpu.memory_space<vmem>>) attributes {dimension_semantics = [], scalar_prefetch = 0 : i64, scratch_operands = 0 : i64, tpu.core_type = #tpu.core_type<tc>} {
    %c0 = arith.constant 0 : index
    %c0_0 = arith.constant 0 : index
    %0 = vector.load %arg0[%c0, %c0_0] : memref<8x128xf32, #tpu.memory_space<vmem>>, vector<8x128xf32>
    %1 = math.tanh %0 : vector<8x128xf32>
    %c0_1 = arith.constant 0 : index
    %c0_2 = arith.constant 0 : index
    %2 = vector.load %arg1[%c0_1, %c0_2] : memref<8x128xf32, #tpu.memory_space<vmem>>, vector<8x128xf32>
    tpu.vector_store %arg1[%c0_1, %c0_2], %1 {strides = array<i32>} : memref<8x128xf32, #tpu.memory_space<vmem>>, vector<8x128xf32>,
    return
  }
}

</mosaic_0001>

<bundles_post_ra>
// kernel: tpu_custom_call.1
= control target key start
LH: loop header
LB: loop body
LE: loop exit
PB: predicated region body
PF: predicated region fallthrough
CT: control target
= control target key end

     0   :  { %6 = vsyncpa [#allocation3], 0  ;;  %s117_s0 = inlined_call_operand.hbm [shape: f32[8,128], index: 0, kind: input, shape index: {}]   ;;  %s118_s1 = inlined_call_operand.hbm [shape: f32[8,128], index: 1, kind: output, shape index: {}]  }
   0x1   :  { %7 = vsyncpa [#allocation4], 0  ;;  %s13_s8 = sshll.u32 %s117_s0, 4  ;;  %s99_s9 = smov [#allocation2]   ;;  %s14_s8 = int_to_ptr.hbm [resolvable:$true] %s13_s8 }
   0x2   :  { %s15_s10 = sshll.u32 %s99_s9, 4  ;;  %s16_s10 = int_to_ptr.vmem [resolvable:$true] %s15_s10 }
   0x3   :  { %18 = dma.hbm_to_vmem [thread:$0]  %s14_s8, 128, %s16_s10, [#allocation3]  }
   0x4   :  { %95 = dma.done.wait [#allocation3], 128  }
   0x5   :  { %96 = vsyncadd [#allocation3], 4294967168  ;;  %v23_v0 = vld [vmem:[#allocation2] sm:$0xff]  ;;  %s100_s11 = smov [#allocation5]   ;;  %s33_s15 = sshll.u32 %s118_s1, 4  ;;  %s34_s15 = int_to_ptr.hbm [resolvable:$true] %s33_s15 }
   0x6   :  { %45 = vtanh.f32 %v23_v0  ;;  %s31_s12 = sshll.u32 %s100_s11, 4  ;;  %s32_s12 = int_to_ptr.vmem [resolvable:$true] %s31_s12 }
   0xc   :  { %v46_v1 = vpop.eup %45 }
   0xd   :  { %25 = vst [vmem:[#allocation5] sm:$0xff] %v46_v1 }
   0xe   :  { %36 = dma.vmem_to_hbm [thread:$0]  %s32_s12, 128, %s34_s15, [#allocation4]  }
   0xf   :  { %97 = dma.done.wait [#allocation4], 128  }
  0x10   :  { %98 = vsyncadd [#allocation4], 4294967168 }
  0x11   :  { %41 = vsyncpa [#allocation3], 1 }
  0x12   :  { %42 = vsyncpa [#allocation4], 1 }

</bundles_post_ra>
